<compile_context>
chip_gen: v7x
topology: tpu7x:2x2x1
jax: 0.10.0
libtpu: 0.0.40
codegen_flags: <defaults>
</compile_context>

<pallas_src>
import jax
import jax.numpy as jnp
from jax import lax
from jax.experimental import pallas as pl
from jax.experimental.pallas import tpu as pltpu

LANES = 128
SUBLANES = 8
CHUNK_ROWS = 512                       # per-chunk f32 temporaries ~0.25 MiB each
TARGET_BLOCK_BYTES = 4 * 1024 * 1024   # ~4 MiB of native-dtype HBM per input per step
VMEM_LIMIT_BYTES = 48 * 1024 * 1024    # < v7x 64 MiB physical; fine on v5e/v6e (128 MiB)


def _round_up(x, m):
    return ((x + m - 1) // m) * m


@jax.jit
def focal_loss(pred, gt):
    """CenterNet modified focal loss. pred, gt: (B, C, H, W). Returns f32 scalar."""
    assert pred.shape == gt.shape
    n = pred.size

    # --- copy-free lane-dense 2-D view --------------------------------------
    if n % LANES == 0:
        pred2d = pred.reshape(-1, LANES)          # contiguous reshape: no HBM copy
        gt2d = gt.reshape(-1, LANES)
    else:
        # Rare fallback: pad to a multiple of 1024 (rows multiple of 8) with
        # neutral values.  gt = 2.0 is neither positive (==1) nor negative (<1),
        # so padded elements contribute exactly 0 to every sum.
        pad = (-n) % (LANES * SUBLANES)
        pred2d = jnp.pad(pred.reshape(-1), (0, pad),
                         constant_values=0.5).reshape(-1, LANES)
        gt2d = jnp.pad(gt.reshape(-1), (0, pad),
                       constant_values=2.0).reshape(-1, LANES)

    rows = pred2d.shape[0]
    itemsize = max(pred2d.dtype.itemsize, gt2d.dtype.itemsize)
    max_block_rows = max(
        CHUNK_ROWS,
        (TARGET_BLOCK_BYTES // (LANES * itemsize)) // CHUNK_ROWS * CHUNK_ROWS)

    if rows >= CHUNK_ROWS:
        block_rows = min(max_block_rows, _round_up(rows, CHUNK_ROWS))
        chunk_rows = CHUNK_ROWS
    else:
        block_rows = _round_up(rows, SUBLANES)
        chunk_rows = block_rows

    num_blocks = pl.cdiv(rows, block_rows)
    num_chunks = block_rows // chunk_rows
    has_tail_rows = (num_blocks * block_rows) != rows   # static flag

    def kernel(pred_ref, gt_ref, out_ref):
        def fold(x):
            # (chunk_rows, 128) -> (8, 128): pure VPU adds, tiling-aligned reshape.
            return x.reshape(-1, SUBLANES, LANES).sum(axis=0)

        def run(mask_tail):
            tail_base = (num_blocks - 1) * block_rows   # static; only used if mask_tail

            def body(c, carry):
                loss_acc, pos_acc = carry
                start = pl.multiple_of(c * chunk_rows, chunk_rows)
                pred_t = pred_ref[pl.ds(start, chunk_rows), :].astype(jnp.float32)
                gt_t = gt_ref[pl.ds(start, chunk_rows), :].astype(jnp.float32)

                if mask_tail:
                    # Only emitted for the (single) partial last block: mask the
                    # garbage rows with gt = 2.0 so every select below picks 0.0
                    # and garbage pred (NaN/inf from log) never propagates.
                    row = tail_base + start + lax.broadcasted_iota(
                        jnp.int32, (chunk_rows, LANES), 0)
                    gt_t = jnp.where(row < rows, gt_t, 2.0)

                one_m_pred = 1.0 - pred_t
                one_m_gt = 1.0 - gt_t
                sq = one_m_gt * one_m_gt
                neg_w = sq * sq                          # (1 - gt) ** 4
                is_pos = gt_t == 1.0
                is_neg = gt_t < 1.0

                pos_term = jnp.log(pred_t) * (one_m_pred * one_m_pred)
                neg_term = jnp.log(one_m_pred) * (pred_t * pred_t) * neg_w
                # gt==1 and gt<1 are disjoint -> single merged loss slab.
                loss_t = jnp.where(is_pos, pos_term,
                                   jnp.where(is_neg, neg_term, 0.0))
                pos_t = jnp.where(is_pos, 1.0, 0.0)

                return loss_acc + fold(loss_t), pos_acc + fold(pos_t)

            zero = jnp.zeros((SUBLANES, LANES), jnp.float32)
            loss_acc, pos_acc = lax.fori_loop(0, num_chunks, body, (zero, zero))
            out_ref[0, 0] = loss_acc
            out_ref[0, 1] = pos_acc

        if not has_tail_rows:
            run(False)                                   # no masking anywhere
        elif num_blocks == 1:
            run(True)                                    # the only block is partial
        else:
            is_last = pl.program_id(0) == num_blocks - 1
            pl.when(is_last)(lambda: run(True))          # masked path, last block only
            pl.when(jnp.logical_not(is_last))(lambda: run(False))  # fast path

    bytes_accessed = (n * (pred2d.dtype.itemsize + gt2d.dtype.itemsize)
                      + num_blocks * 2 * SUBLANES * LANES * 4)
    cost = pl.CostEstimate(flops=16 * n, transcendentals=2 * n,
                           bytes_accessed=bytes_accessed)

    partial = pl.pallas_call(
        kernel,
        out_shape=jax.ShapeDtypeStruct((num_blocks, 2, SUBLANES, LANES),
                                       jnp.float32),
        grid_spec=pltpu.PrefetchScalarGridSpec(
            num_scalar_prefetch=0,
            grid=(num_blocks,),
            in_specs=[
                pl.BlockSpec((block_rows, LANES), lambda i: (i, 0)),
                pl.BlockSpec((block_rows, LANES), lambda i: (i, 0)),
            ],
            out_specs=pl.BlockSpec((1, 2, SUBLANES, LANES),
                                   lambda i: (i, 0, 0, 0)),
        ),
        compiler_params=pltpu.CompilerParams(
            dimension_semantics=("parallel",),
            vmem_limit_bytes=VMEM_LIMIT_BYTES,
        ),
        cost_estimate=cost,
    )(pred2d, gt2d)

    sums = jnp.sum(partial, axis=(0, 2, 3))              # (2,): loss_sum, num_pos
    loss_sum, num_pos = sums[0], sums[1]
    # pos part of loss_sum is exactly 0 whenever num_pos == 0, so this single
    # safe divide reproduces both branches of the PyTorch reference.
    safe_num_pos = jnp.where(num_pos == 0.0, 1.0, num_pos)
    return -loss_sum / safe_num_pos


def _reference_focal_loss(pred, gt):
    pred = pred.astype(jnp.float32)
    gt = gt.astype(jnp.float32)
    pos_inds = (gt == 1.0).astype(jnp.float32)
    neg_inds = (gt < 1.0).astype(jnp.float32)
    neg_weights = (1.0 - gt) ** 4
    pos_loss = jnp.log(pred) * (1.0 - pred) ** 2 * pos_inds
    neg_loss = jnp.log(1.0 - pred) * pred ** 2 * neg_weights * neg_inds
    num_pos = pos_inds.sum()
    pos_loss = pos_loss.sum()
    neg_loss = neg_loss.sum()
    safe = jnp.where(num_pos == 0.0, 1.0, num_pos)
    return jnp.where(num_pos == 0.0, -neg_loss,
                     -(pos_loss / safe + neg_loss / safe))


def _make_inputs(key, shape, dtype=jnp.float32):
    k1, k2, k3 = jax.random.split(key, 3)
    # pred: sigmoid-like probabilities strictly in (0, 1)
    pred = jax.nn.sigmoid(jax.random.normal(k1, shape, jnp.float32))
    pred = jnp.clip(pred, 1e-4, 1.0 - 1e-4)
    # gt: gaussian-splat-like heatmap in [0, 0.99) with a few exact 1.0 peaks
    gt = jax.random.uniform(k2, shape, jnp.float32, 0.0, 0.99)
    peak = jax.random.uniform(k3, shape) > 0.98
    gt = jnp.where(peak, 1.0, gt)
    return pred.astype(dtype), gt.astype(dtype)


if __name__ == "__main__":
    key = jax.random.PRNGKey(0)

    # Primary small test, (batch, c, h, w) as implied by the module.
    pred, gt = _make_inputs(key, (2, 4, 16, 16))
    loss = jax.block_until_ready(focal_loss(pred, gt))
    ref = _reference_focal_loss(pred, gt)
    assert jnp.allclose(loss, ref, rtol=1e-5, atol=1e-5), (loss, ref)

    # Multi-block path with a ragged (partial) last block -> gated tail masking
    # plus the unmasked fast path on the first block.
    pred2, gt2 = _make_inputs(jax.random.PRNGKey(1), (2, 6, 750, 128))
    loss2 = jax.block_until_ready(focal_loss(pred2, gt2))
    ref2 = _reference_focal_loss(pred2, gt2)
    assert jnp.allclose(loss2, ref2, rtol=1e-5, atol=1e-5), (loss2, ref2)

    # Native bf16 inputs (no wrapper-side upcast; cast happens in vregs).
    pred3, gt3 = _make_inputs(jax.random.PRNGKey(2), (2, 4, 16, 16),
                              jnp.bfloat16)
    loss3 = jax.block_until_ready(focal_loss(pred3, gt3))
    ref3 = _reference_focal_loss(pred3, gt3)
    assert jnp.allclose(loss3, ref3, rtol=1e-4, atol=1e-4), (loss3, ref3)

    # n not a multiple of 128 -> wrapper pads with neutral values (gt = 2.0).
    pred4, gt4 = _make_inputs(jax.random.PRNGKey(3), (3, 2, 20, 20))
    loss4 = jax.block_until_ready(focal_loss(pred4, gt4))
    ref4 = _reference_focal_loss(pred4, gt4)
    assert jnp.allclose(loss4, ref4, rtol=1e-5, atol=1e-5), (loss4, ref4)

    print("KERNEL_OK")
</pallas_src>

<mosaic_0001>
module attributes {stable_mosaic.version = 11 : i64} {
  func.func @kernel(%arg0: i32, %arg1: memref<16x128xf32, #tpu.memory_space<vmem>>, %arg2: memref<16x128xf32, #tpu.memory_space<vmem>>, %arg3: memref<1x2x8x128xf32, #tpu.memory_space<vmem>>) attributes {dimension_semantics = [#tpu.dimension_semantics<parallel>], iteration_bounds = array<i64: 1>, scalar_prefetch = 0 : i64, scratch_operands = 0 : i64, tpu.core_type = #tpu.core_type<tc>, window_params = [{transform_indices = @transform_0, window_bounds = array<i64: 16, 128>}, {transform_indices = @transform_1, window_bounds = array<i64: 16, 128>}, {transform_indices = @transform_2, window_bounds = array<i64: 1, 2, 8, 128>}]} {
    %cst = arith.constant 0.000000e+00 : f32
    %0 = vector.broadcast %cst : f32 to vector<8x128xf32>
    %c0_i32 = arith.constant 0 : i32
    %c16_i32 = arith.constant 16 : i32
    %1 = arith.muli %c0_i32, %c16_i32 : i32
    %2 = tpu.assume_multiple %1, 16 : i32
    %3 = arith.index_cast %2 : i32 to index
    %c0 = arith.constant 0 : index
    %4 = vector.load %arg1[%3, %c0] : memref<16x128xf32, #tpu.memory_space<vmem>>, vector<16x128xf32>
    %5 = arith.index_cast %2 : i32 to index
    %c0_0 = arith.constant 0 : index
    %6 = vector.load %arg2[%5, %c0_0] : memref<16x128xf32, #tpu.memory_space<vmem>>, vector<16x128xf32>
    %cst_1 = arith.constant 1.000000e+00 : f32
    %7 = vector.broadcast %cst_1 : f32 to vector<16x128xf32>
    %8 = arith.subf %7, %4 : vector<16x128xf32>
    %cst_2 = arith.constant 1.000000e+00 : f32
    %9 = vector.broadcast %cst_2 : f32 to vector<16x128xf32>
    %10 = arith.subf %9, %6 : vector<16x128xf32>
    %11 = arith.mulf %10, %10 : vector<16x128xf32>
    %12 = arith.mulf %11, %11 : vector<16x128xf32>
    %cst_3 = arith.constant 1.000000e+00 : f32
    %13 = vector.broadcast %cst_3 : f32 to vector<16x128xf32>
    %14 = arith.cmpf oeq, %6, %13 : vector<16x128xf32>
    %cst_4 = arith.constant 1.000000e+00 : f32
    %15 = vector.broadcast %cst_4 : f32 to vector<16x128xf32>
    %16 = arith.cmpf olt, %6, %15 : vector<16x128xf32>
    %17 = math.log %4 : vector<16x128xf32>
    %18 = arith.mulf %8, %8 : vector<16x128xf32>
    %19 = arith.mulf %17, %18 : vector<16x128xf32>
    %20 = math.log %8 : vector<16x128xf32>
    %21 = arith.mulf %4, %4 : vector<16x128xf32>
    %22 = arith.mulf %20, %21 : vector<16x128xf32>
    %23 = arith.mulf %22, %12 : vector<16x128xf32>
    %cst_5 = arith.constant 0.000000e+00 : f32
    %24 = vector.broadcast %cst_5 : f32 to vector<16x128xf32>
    %25 = arith.select %16, %23, %24 : vector<16x128xi1>, vector<16x128xf32>
    %26 = arith.select %14, %19, %25 : vector<16x128xi1>, vector<16x128xf32>
    %cst_6 = arith.constant 1.000000e+00 : f32
    %cst_7 = arith.constant 0.000000e+00 : f32
    %27 = vector.broadcast %cst_6 : f32 to vector<16x128xf32>
    %28 = vector.broadcast %cst_7 : f32 to vector<16x128xf32>
    %29 = arith.select %14, %27, %28 : vector<16x128xi1>, vector<16x128xf32>
    %30 = vector.shape_cast %26 : vector<16x128xf32> to vector<2x8x128xf32>
    %cst_8 = arith.constant dense<0.000000e+00> : vector<8x128xf32>
    %31 = vector.multi_reduction <add>, %30, %cst_8 [0] : vector<2x8x128xf32> to vector<8x128xf32>
    %32 = arith.addf %0, %31 : vector<8x128xf32>
    %33 = vector.shape_cast %29 : vector<16x128xf32> to vector<2x8x128xf32>
    %cst_9 = arith.constant dense<0.000000e+00> : vector<8x128xf32>
    %34 = vector.multi_reduction <add>, %33, %cst_9 [0] : vector<2x8x128xf32> to vector<8x128xf32>
    %35 = arith.addf %0, %34 : vector<8x128xf32>
    %c1_i32 = arith.constant 1 : i32
    %c0_10 = arith.constant 0 : index
    %c0_11 = arith.constant 0 : index
    %c0_12 = arith.constant 0 : index
    %c0_13 = arith.constant 0 : index
    %36 = vector.load %arg3[%c0_10, %c0_11, %c0_12, %c0_13] : memref<1x2x8x128xf32, #tpu.memory_space<vmem>>, vector<1x1x8x128xf32>
    %37 = vector.shape_cast %36 : vector<1x1x8x128xf32> to vector<8x128xf32>
    %38 = vector.shape_cast %32 : vector<8x128xf32> to vector<1x1x8x128xf32>
    tpu.vector_store %arg3[%c0_10, %c0_11, %c0_12, %c0_13], %38 {strides = array<i32>} : memref<1x2x8x128xf32, #tpu.memory_space<vmem>>, vector<1x1x8x128xf32>,
    %c0_14 = arith.constant 0 : index
    %c1 = arith.constant 1 : index
    %c0_15 = arith.constant 0 : index
    %c0_16 = arith.constant 0 : index
    %39 = vector.load %arg3[%c0_14, %c1, %c0_15, %c0_16] : memref<1x2x8x128xf32, #tpu.memory_space<vmem>>, vector<1x1x8x128xf32>
    %40 = vector.shape_cast %39 : vector<1x1x8x128xf32> to vector<8x128xf32>
    %41 = vector.shape_cast %35 : vector<8x128xf32> to vector<1x1x8x128xf32>
    tpu.vector_store %arg3[%c0_14, %c1, %c0_15, %c0_16], %41 {strides = array<i32>} : memref<1x2x8x128xf32, #tpu.memory_space<vmem>>, vector<1x1x8x128xf32>,
    return
  }
  func.func @transform_0(%arg0: i32) -> (i32, i32) {
    %c0_i32 = arith.constant 0 : i32
    %c0_i32_0 = arith.constant 0 : i32
    return %arg0, %c0_i32 : i32, i32
  }
  func.func @transform_1(%arg0: i32) -> (i32, i32) {
    %c0_i32 = arith.constant 0 : i32
    %c0_i32_0 = arith.constant 0 : i32
    return %arg0, %c0_i32 : i32, i32
  }
  func.func @transform_2(%arg0: i32) -> (i32, i32, i32, i32) {
    %c0_i32 = arith.constant 0 : i32
    %c0_i32_0 = arith.constant 0 : i32
    %c0_i32_1 = arith.constant 0 : i32
    %c0_i32_2 = arith.constant 0 : i32
    return %arg0, %c0_i32, %c0_i32_0, %c0_i32_1 : i32, i32, i32, i32
  }
}

</mosaic_0001>

<bundles_post_ra>
// kernel: focal_loss.1
= control target key start
LH: loop header
LB: loop body
LE: loop exit
PB: predicated region body
PF: predicated region fallthrough
CT: control target
= control target key end

     0   :  { %v72_v6 = vmov 0.0   ;;  %s110_s0 = inlined_call_operand.vmem [shape: f32[16,128], index: 0, kind: input, shape index: {}]   ;;  %s111_s1 = inlined_call_operand.vmem [shape: f32[16,128], index: 1, kind: input, shape index: {}]   ;;  %s112_s2 = inlined_call_operand.vmem [shape: f32[1,2,8,128], index: 2, kind: output, shape index: {}]  }
   0x1   :  { %v11_v0 = vld [vmem:[%s110_s0] sm:$0xff]  ;;  %v12_v1 = vld [vmem:[%s110_s0 + $0x8] sm:$0xff] }
   0x2   :  { %v13_v2 = vld [vmem:[%s111_s1] sm:$0xff]  ;;  %v14_v3 = vld [vmem:[%s111_s1 + $0x8] sm:$0xff]  ;;  %v15_v4 = vsub.f32 1.0, %v11_v0  ;;  %v16_v5 = vsub.f32 1.0, %v12_v1  ;;  %64 = vlog2.f32 %v11_v0  ;;  %v39_v16 = vmul.f32 %v11_v0, %v11_v0 }
   0x3   :  { %vm23_vm0 = vcmp.eq.f32.partialorder %v13_v2, 1.0  ;;  %vm24_vm1 = vcmp.eq.f32.partialorder %v14_v3, 1.0  ;;  %66 = vlog2.f32 %v12_v1  ;;  %v17_v10 = vsub.f32 1.0, %v13_v2 }
   0x4   :  { %68 = vlog2.f32 %v15_v4  ;;  %v49_v7 = vsel %vm23_vm0, 1.0, %v72_v6  ;;  %v50_v8 = vsel %vm24_vm1, 1.0, %v72_v6  ;;  %v18_v11 = vsub.f32 1.0, %v14_v3 }
   0x5   :  { %70 = vlog2.f32 %v16_v5  ;;  %v53_v9 = vadd.f32 %v50_v8, %v49_v7  ;;  %v19_v12 = vmul.f32 %v17_v10, %v17_v10  ;;  %v31_v19 = vmul.f32 %v15_v4, %v15_v4 }
   0x6   :  { %v20_v14 = vmul.f32 %v18_v11, %v18_v11  ;;  %v40_v20 = vmul.f32 %v12_v1, %v12_v1  ;;  %v32_v24 = vmul.f32 %v16_v5, %v16_v5  ;;  %vm25_vm2 = vcmp.lt.f32.partialorder %v13_v2, 1.0 }
   0x7   :  { %62 = vst [vmem:[%s112_s2 + $0x8] sm:$0xff] %v53_v9  ;;  %v21_v22 = vmul.f32 %v19_v12, %v19_v12  ;;  %vm26_vm3 = vcmp.lt.f32.partialorder %v14_v3, 1.0 }
   0x8   :  { %v22_v26 = vmul.f32 %v20_v14, %v20_v14 }
   0xc   :  { %v65_v13 = vpop.eup %64 }
   0xd   :  { %v67_v15 = vpop.eup %66  ;;  %v28_v18 = vmul.f32 0.6931472, %v65_v13 }
   0xe   :  { %v69_v17 = vpop.eup %68  ;;  %v30_v23 = vmul.f32 0.6931472, %v67_v15 }
   0xf   :  { %v71_v21 = vpop.eup %70  ;;  %v36_v25 = vmul.f32 0.6931472, %v69_v17  ;;  %v33_v29 = vmul.f32 %v31_v19, %v28_v18 }
  0x10   :  { %v38_v27 = vmul.f32 0.6931472, %v71_v21  ;;  %v34_v31 = vmul.f32 %v32_v24, %v30_v23 }
  0x11   :  { %v41_v28 = vmul.f32 %v39_v16, %v36_v25 }
  0x12   :  { %v42_v30 = vmul.f32 %v40_v20, %v38_v27 }
  0x13   :  { %v43_v32 = vmul.f32 %v41_v28, %v21_v22 }
  0x14   :  { %v44_v33 = vmul.f32 %v42_v30, %v22_v26 }
  0x15   :  { %v45_v34 = vsel %vm25_vm2, %v43_v32, 0.0 }
  0x16   :  { %v46_v35 = vsel %vm26_vm3, %v44_v33, 0.0  ;;  %v47_v36 = vsel %vm23_vm0, %v33_v29, %v45_v34 }
  0x17   :  { %v48_v37 = vsel %vm24_vm1, %v34_v31, %v46_v35 }
  0x18   :  { %v51_v38 = vadd.f32 %v48_v37, %v47_v36 }
  0x1a   :  { %55 = vst [vmem:[%s112_s2] sm:$0xff] %v51_v38 }

</bundles_post_ra>
